<compile_context>
chip_gen: v6e
topology: v6e:2x2x1
jax: 0.10.0
libtpu: 0.0.40
codegen_flags: <defaults>
</compile_context>

<pallas_src>
import math
import numpy as np

import jax
import jax.numpy as jnp
from jax.experimental import pallas as pl
from jax.experimental.pallas import tpu as pltpu


def _gaussian_1d(sigma: int) -> np.ndarray:
    """1-D weights, replicating the PyTorch buffer (NOT normalized, on purpose)."""
    K = max(2 * sigma + 1, 3)
    m = np.arange(K, dtype=np.float32)
    mean = (K - 1) / 2.0
    g = (1.0 / (sigma * math.sqrt(2.0 * math.pi))) * np.exp(
        -(((m - mean) / (2.0 * sigma)) ** 2)
    )
    return g.astype(np.float32)


def make_gaussian_weights(sigma: int) -> np.ndarray:
    """3-D (K, K, K) kernel = outer product of the 1-D weights (num_dims=3)."""
    g = _gaussian_1d(sigma)
    return (g[:, None, None] * g[None, :, None] * g[None, None, :]).astype(np.float32)


def _band_matrix(length: int, g1: np.ndarray) -> np.ndarray:
    """(length, length) banded matrix B with  out = x @ B  equal to the
    'same' zero-padded cross-correlation of x with g1 along that axis."""
    K = g1.shape[0]
    p = (K - 1) // 2
    B = np.zeros((length, length), dtype=np.float32)
    for o in range(length):
        for k in range(K):
            i = o + k - p
            if 0 <= i < length:
                B[i, o] = g1[k]
    return B


def _gaussian3d_kernel(x_ref, mhw_ref, bdt_ref, o_ref):
    """One batch element per program.

    x_ref  : (1, D, H*W) input slab (VMEM)
    mhw_ref: (H*W, H*W)  kron(B_H, B_W) -- fused H & W separable passes
    bdt_ref: (D, D)      B_D^T          -- D separable pass
    o_ref  : (1, D, H*W) output slab (VMEM)
    """
    x = x_ref[0]  # (D, H*W), f32

    # H & W passes fused into one lane-dense MXU matmul (contract folded H*W).
    y = jnp.dot(
        x, mhw_ref[...],
        preferred_element_type=jnp.float32,
        precision=jax.lax.Precision.HIGHEST,
    )
    # D pass: small (D, D) banded matmul applied from the left.
    z = jnp.dot(
        bdt_ref[...], y,
        preferred_element_type=jnp.float32,
        precision=jax.lax.Precision.HIGHEST,
    )

    o_ref[0] = z.astype(o_ref.dtype)  # single store per output slab


def gaussian_forward(x_ncdhw: jax.Array, sigma: int) -> jax.Array:
    """x_ncdhw: (N, 1, D, H, W) float32 -> (N, 1, D, H, W) float32."""
    assert x_ncdhw.ndim == 5 and x_ncdhw.shape[1] == 1
    N, _, D, H, W = x_ncdhw.shape
    HW = H * W

    g1 = _gaussian_1d(sigma)
    bw = _band_matrix(W, g1)
    bh = _band_matrix(H, g1)
    bd = _band_matrix(D, g1)
    mhw = jnp.asarray(np.kron(bh, bw).astype(np.float32))  # (H*W, H*W), zero-pad baked in
    bdt = jnp.asarray(bd.T.astype(np.float32))              # (D, D)

    # Free layout glue: squeeze the size-1 channel and fold (H, W) -> lane-dense H*W.
    x = x_ncdhw.reshape(N, D, HW).astype(jnp.float32)

    out = pl.pallas_call(
        _gaussian3d_kernel,
        out_shape=jax.ShapeDtypeStruct((N, D, HW), jnp.float32),
        grid_spec=pltpu.PrefetchScalarGridSpec(
            num_scalar_prefetch=0,
            grid=(N,),
            in_specs=[
                pl.BlockSpec((1, D, HW), lambda n: (n, 0, 0)),
                pl.BlockSpec((HW, HW), lambda n: (0, 0)),  # resident across grid
                pl.BlockSpec((D, D), lambda n: (0, 0)),    # resident across grid
            ],
            out_specs=pl.BlockSpec((1, D, HW), lambda n: (n, 0, 0)),
        ),
        compiler_params=pltpu.CompilerParams(
            dimension_semantics=("parallel",),  # batch axis feeds both TCs on v7x
        ),
    )(x, mhw, bdt)

    return out.reshape(N, 1, D, H, W)


def _reference_forward(x_ncdhw: jax.Array, sigma: int) -> jax.Array:
    """Pure-XLA reference (conv3d cross-correlation) for the correctness check."""
    K = max(2 * sigma + 1, 3)
    p = (K - 1) // 2
    w = jnp.asarray(make_gaussian_weights(sigma))[None, None]  # (O=1, I=1, K, K, K)
    return jax.lax.conv_general_dilated(
        x_ncdhw, w,
        window_strides=(1, 1, 1),
        padding=[(p, p), (p, p), (p, p)],
        dimension_numbers=("NCDHW", "OIDHW", "NCDHW"),
        precision=jax.lax.Precision.HIGHEST,
    )


if __name__ == "__main__":
    sigma = 1                        # K = 3, padding = 1
    N, C, D, H, W = 2, 1, 8, 8, 16   # H*W = 128 -> lane-dense last dim
    key = jax.random.PRNGKey(0)
    x = jax.random.normal(key, (N, C, D, H, W), dtype=jnp.float32)

    y = jax.block_until_ready(gaussian_forward(x, sigma))
    y_ref = jax.block_until_ready(_reference_forward(x, sigma))

    assert y.shape == (N, C, D, H, W)
    np.testing.assert_allclose(np.asarray(y), np.asarray(y_ref), rtol=1e-4, atol=1e-4)

    print("KERNEL_OK")
</pallas_src>

<mosaic_0001>
module attributes {stable_mosaic.version = 11 : i64} {
  func.func @_gaussian3d_kernel(%arg0: i32, %arg1: memref<1x8x128xf32, #tpu.memory_space<vmem>>, %arg2: memref<128x128xf32, #tpu.memory_space<vmem>>, %arg3: memref<8x8xf32, #tpu.memory_space<vmem>>, %arg4: memref<1x8x128xf32, #tpu.memory_space<vmem>>) attributes {dimension_semantics = [#tpu.dimension_semantics<parallel>], iteration_bounds = array<i64: 2>, scalar_prefetch = 0 : i64, scratch_operands = 0 : i64, tpu.core_type = #tpu.core_type<tc>, window_params = [{transform_indices = @transform_0, window_bounds = array<i64: 1, 8, 128>}, {pipeline_mode = #tpu.pipeline_mode<synchronous>, transform_indices = @transform_1, window_bounds = array<i64: 128, 128>}, {pipeline_mode = #tpu.pipeline_mode<synchronous>, transform_indices = @transform_2, window_bounds = array<i64: 8, 8>}, {transform_indices = @transform_3, window_bounds = array<i64: 1, 8, 128>}]} {
    %c0 = arith.constant 0 : index
    %c0_0 = arith.constant 0 : index
    %c0_1 = arith.constant 0 : index
    %0 = vector.load %arg1[%c0, %c0_0, %c0_1] : memref<1x8x128xf32, #tpu.memory_space<vmem>>, vector<1x8x128xf32>
    %1 = vector.shape_cast %0 : vector<1x8x128xf32> to vector<8x128xf32>
    %c0_2 = arith.constant 0 : index
    %c0_3 = arith.constant 0 : index
    %2 = vector.load %arg2[%c0_2, %c0_3] : memref<128x128xf32, #tpu.memory_space<vmem>>, vector<128x128xf32>
    %cst = arith.constant dense<0.000000e+00> : vector<8x128xf32>
    %3 = tpu.matmul %1, %2, %cst {dimension_numbers = #tpu.dot_dimension_numbers<[1], [0], [0], [1], [0, 0, 1, 1], [], []>, precision = #tpu.contract_precision<fp32>} : vector<8x128xf32>, vector<128x128xf32>, vector<8x128xf32> -> vector<8x128xf32>
    %c0_4 = arith.constant 0 : index
    %c0_5 = arith.constant 0 : index
    %4 = vector.load %arg3[%c0_4, %c0_5] : memref<8x8xf32, #tpu.memory_space<vmem>>, vector<8x8xf32>
    %cst_6 = arith.constant dense<0.000000e+00> : vector<8x128xf32>
    %5 = tpu.matmul %4, %3, %cst_6 {dimension_numbers = #tpu.dot_dimension_numbers<[1], [0], [0], [1], [0, 0, 1, 1], [], []>, precision = #tpu.contract_precision<fp32>} : vector<8x8xf32>, vector<8x128xf32>, vector<8x128xf32> -> vector<8x128xf32>
    %c0_7 = arith.constant 0 : index
    %c0_8 = arith.constant 0 : index
    %c0_9 = arith.constant 0 : index
    %6 = vector.load %arg4[%c0_7, %c0_8, %c0_9] : memref<1x8x128xf32, #tpu.memory_space<vmem>>, vector<1x8x128xf32>
    %7 = vector.shape_cast %6 : vector<1x8x128xf32> to vector<8x128xf32>
    %8 = vector.shape_cast %5 : vector<8x128xf32> to vector<1x8x128xf32>
    tpu.vector_store %arg4[%c0_7, %c0_8, %c0_9], %8 {strides = array<i32>} : memref<1x8x128xf32, #tpu.memory_space<vmem>>, vector<1x8x128xf32>,
    return
  }
  func.func @transform_0(%arg0: i32) -> (i32, i32, i32) {
    %c0_i32 = arith.constant 0 : i32
    %c0_i32_0 = arith.constant 0 : i32
    %c0_i32_1 = arith.constant 0 : i32
    return %arg0, %c0_i32, %c0_i32_0 : i32, i32, i32
  }
  func.func @transform_1(%arg0: i32) -> (i32, i32) {
    %c0_i32 = arith.constant 0 : i32
    %c0_i32_0 = arith.constant 0 : i32
    %c0_i32_1 = arith.constant 0 : i32
    return %c0_i32, %c0_i32_0 : i32, i32
  }
  func.func @transform_2(%arg0: i32) -> (i32, i32) {
    %c0_i32 = arith.constant 0 : i32
    %c0_i32_0 = arith.constant 0 : i32
    %c0_i32_1 = arith.constant 0 : i32
    return %c0_i32, %c0_i32_0 : i32, i32
  }
  func.func @transform_3(%arg0: i32) -> (i32, i32, i32) {
    %c0_i32 = arith.constant 0 : i32
    %c0_i32_0 = arith.constant 0 : i32
    %c0_i32_1 = arith.constant 0 : i32
    return %arg0, %c0_i32, %c0_i32_0 : i32, i32, i32
  }
}

</mosaic_0001>

<bundles_post_ra>
// kernel: tpu_custom_call.1
= control target key start
LH: loop header
LB: loop body
LE: loop exit
PB: predicated region body
PF: predicated region fallthrough
CT: control target
= control target key end

     0   :  { %8 = vsyncpa [#allocation3], 0  ;;  %s2604_s0 = inlined_call_operand.hbm [shape: f32[2,8,128], index: 0, kind: input, shape index: {}]   ;;  %s2605_s1 = inlined_call_operand.hbm [shape: f32[128,128], index: 1, kind: input, shape index: {}]   ;;  %s2606_s2 = inlined_call_operand.hbm [shape: f32[8,8], index: 2, kind: input, shape index: {}]   ;;  %s2607_s3 = inlined_call_operand.hbm [shape: f32[2,8,128], index: 3, kind: output, shape index: {}]  }
   0x1   :  { %10 = vsyncpa [#allocation3 + $0x1], 0 }
   0x2   :  { %11 = vsyncpa [#allocation6], 0 }
   0x3   :  { %12 = vsyncpa [#allocation4], 0 }
   0x4   :  { %14 = vsyncpa [#allocation4 + $0x1], 0  ;;  %s2045_s12 = smov 0   ;;  %s2047_s13 = smov 0  }
   0x5   :  { %s2049_s14 = smov 0   ;;  %s2051_s15 = smov 0  }
   0x6 LB: > { %s2066_s16 = sadd.s32 4294967295, %s2015_s15   ;;  %s1426_s17 = sadd.s32 4294967294, %s2015_s15   ;;  %s2015_s15 = sphi %s2051_s15, %s2629_s15   ;;  %s2011_s14 = sphi %s2049_s14, %s2628_s14   ;;  %s2007_s13 = sphi %s2047_s13, %s2627_s13   ;;  %s2003_s12 = sphi %s2045_s12, %s2626_s12  }
   0x7   : > { %p40_p0 = scmp.ne.s32.totalorder %s2007_s13, %s2003_s12  ;;  %p2608_p1 = scmp.eq.s32.totalorder %s2066_s16, 0 }
   0x8   : > { %p112_p3 = scmp.eq.s32.totalorder %s1426_s17, 1  ;;  %p1427_p5 = scmp.ge.s32.totalorder %s2015_s15, 1 }
   0x9   : > { %p2075_p4 = por %p2608_p1, %p40_p0  ;;  %p119_p7 = scmp.lt.s32.totalorder %s2015_s15, 3 }
   0xa   : > { %p2080_p6 = por %p112_p3, %p40_p0  ;;  %s2017_s21 = smov [#allocation5]  }
   0xb   : > { %s2612_s18 = scalar_select %p2075_p4, 1, 0 }
   0xc   : > { %s2613_s19 = scalar_select %p2080_p6, 1, 0 }
   0xd   : > { %p2085_p8 = pnand %p1427_p5, %p119_p7  ;;  %s131_s22 = sshll.u32 %s2017_s21, 4  ;;  %s132_s22 = int_to_ptr.vmem [resolvable:$true] %s131_s22 }
   0xe   : > { %s2018_s24 = smov [#allocation7]   ;;  %s1878_s26 = scalar_lea.vmem %s132_s22, 2048 }
   0xf   : > { %s2614_s20 = scalar_select %p2085_p8, 1, 0 }
  0x10   : > { %p1808_p9 = pneg %p2085_p8  ;;  %s145_s25 = sshll.u32 %s2018_s24, 4  ;;  %s146_s25 = int_to_ptr.vmem [resolvable:$true] %s145_s25 }
  0x11   : > { %p1879_p13 = scmp.ne.s32.totalorder %s132_s22, %s1878_s26  ;;  %p1886_p5 = scmp.lt.s32.totalorder %s132_s22, %s132_s22 }
  0x12   : > { %p2094_p11 = pnand %p1808_p9, %p2608_p1  ;;  %p1887_p7 = scmp.lt.s32.totalorder %s1878_s26, %s1878_s26 }
  0x14   : > { %p1869_p12 = pneg %p2094_p11  ;;  %p1888_p10 = por %p1887_p7, %p1886_p5 }
  0x16   : > { %p1881_p0 = pnand %p1879_p13, %p1869_p12 }
  0x18   : > { %p1882_p3 = pneg %p1881_p0 }
  0x1a   : > { %p1889_p9 = pnand %p1888_p10, %p1882_p3 }
  0x1c   : > { %1892 = shalt.err (!%p1889_p9)
}
  0x1d   : > { %s2019_s27 = smov 128   ;;  %s2020_s28 = smov 8  }
  0x1e   : > { %1811 = dma.hbm_to_vmem [thread:$0]  (!%p2094_p11), %s2605_s1, 2048, %s132_s22, [#allocation6], %s2019_s27, %s2019_s27, %s2020_s28  }
  0x1f   : > { %s1904_s4 = scalar_lea.vmem %s146_s25, 128  ;;  %p1912_p2 = scmp.lt.s32.totalorder %s146_s25, %s146_s25 }
  0x20   : > { %p1905_p1 = scmp.ne.s32.totalorder %s146_s25, %s1904_s4  ;;  %p1913_p6 = scmp.lt.s32.totalorder %s1904_s4, %s1904_s4 }
  0x22   : > { %p1907_p13 = pnand %p1905_p1, %p1869_p12  ;;  %p1914_p5 = por %p1913_p6, %p1912_p2 }
  0x24   : > { %p1908_p0 = pneg %p1907_p13 }
  0x26   : > { %p1915_p10 = pnand %p1914_p5, %p1908_p0 }
  0x28   : > { %1918 = shalt.err (!%p1915_p10)
}
  0x29   : > { %1814 = dma.hbm_to_vmem [thread:$0]  (!%p2094_p11), %s2606_s2, 128, %s146_s25, [#allocation6]  }
  0x2a   : > { %s2117_s7 = sadd.s32 1, %s2015_s15   ;;  %s27_s8 = sadd.s32 1, %s2011_s14 }
  0x2b   : > { %s24_s9 = ssub.s32 %s2015_s15, %s2117_s7  ;;  %p34_p1 = scmp.ne.s32.totalorder %s2011_s14, %s2007_s13 }
  0x2c   : > { %p25_p2 = scmp.eq.s32.totalorder %s24_s9, 0  ;;  %p35_p6 = scmp.eq.s32.totalorder %s2015_s15, 0 }
  0x2d   : > { %p2616_p12 = scmp.eq.s32.totalorder %s2066_s16, 1  ;;  %p1825_p7 = scmp.lt.s32.totalorder %s2015_s15, 2 }
  0x2e   : > { %s2133_s11 = scalar_select %p25_p2, %s2011_s14, %s27_s8  }
  0x2f   : > { %p2127_p3 = por %p2616_p12, %p34_p1  ;;  %p36_p9 = por %p35_p6, %p34_p1 }
  0x30   : > { %s156_s17 = sand.u32 1, %s2011_s14   ;;  %s1432_s22 = sshll.u32 %s2015_s15, 7 }
  0x31   : > { %s2617_s10 = scalar_select %p2127_p3, 1, 0 }
  0x32   : > { %s1431_s21 = sshll.u32 %s156_s17, 3  ;;  %s2140_s25 = scalar_lea.hbm %s2604_s0, %s1432_s22 }
  0x33   : > { %s160_s26 = scalar_lea.vmem [#allocation2], %s1431_s21  ;;  %p2142_p11 = pnand %p1825_p7, %p36_p9 }
  0x34   : > { %s167_s27 = sshll.u32 %s160_s26, 4  ;;  %s157_s29 = scalar_lea.sflag [#allocation3], %s156_s17  ;;  %s168_s27 = int_to_ptr.vmem [resolvable:$true] %s167_s27 }
  0x35   : > { %s1919_s30 = scalar_lea.hbm %s2140_s25, 128  ;;  %p1921_p0 = pneg %p2142_p11 }
  0x36   : > { %p1920_p13 = scmp.ne.s32.totalorder %s2140_s25, %s1919_s30  ;;  %s1924_s6 = scalar_lea.hbm %s2604_s0, 256 }
  0x37   : > { %p1925_p1 = scmp.lt.s32.totalorder %s2140_s25, %s2604_s0  ;;  %p1926_p2 = scmp.lt.s32.totalorder %s1924_s6, %s1919_s30 }
  0x38   : > { %p1922_p5 = pnand %p1921_p0, %p1920_p13 }
  0x39   : > { %p1927_p6 = por %p1926_p2, %p1925_p1 }
  0x3a   : > { %p1923_p10 = pneg %p1922_p5 }
  0x3c   : > { %p1928_p12 = pnand %p1927_p6, %p1923_p10 }
  0x3e   : > { %1931 = shalt.err (!%p1928_p12)
}
  0x3f   : > { %s1932_s21 = scalar_lea.vmem %s168_s27, 128  ;;  %s2021_s17 = smov [#allocation2]  }
  0x40   : > { %p1933_p7 = scmp.ne.s32.totalorder %s168_s27, %s1932_s21  ;;  %s1937_s22 = sshll.u32 %s2021_s17, 4  ;;  %s1938_s22 = int_to_ptr.vmem [resolvable:$false] %s1937_s22 }
  0x41   : > { %s1939_s23 = scalar_lea.vmem %s1938_s22, 256  ;;  %p1940_p13 = scmp.lt.s32.totalorder %s168_s27, %s1938_s22 }
  0x42   : > { %p1935_p9 = pnand %p1933_p7, %p1921_p0  ;;  %p1941_p5 = scmp.lt.s32.totalorder %s1939_s23, %s1932_s21 }
  0x44   : > { %p1936_p3 = pneg %p1935_p9  ;;  %p1942_p4 = por %p1941_p5, %p1940_p13 }
  0x46   : > { %p1943_p8 = pnand %p1942_p4, %p1936_p3 }
  0x48   : > { %1946 = shalt.err (!%p1943_p8)
}
  0x49   : > { %1818 = dma.hbm_to_vmem [thread:$0]  (!%p2142_p11), %s2140_s25, 128, %s168_s27, %s157_s29  }
  0x4a   : > { %p2619_p10 = scmp.ne.s32.totalorder %s2614_s20, 0 }
  0x4b   : > { %s2163_s24 = sand.u32 (!%p2619_p10), 1, %s2007_s13   ;;  %p2620_p4 = scmp.ne.s32.totalorder (!%p2619_p10), %s2612_s18, 0 }
  0x4c   : > { %176 = sbr.rel (%p2619_p10) target bundleno = 617 (0x269), region = 32  ;;  %s1434_s26 = sshll.u32 (!%p2619_p10), %s2163_s24, 3 }
  0x4d   : > { %s179_s30 = scalar_lea.sflag (!%p2619_p10), [#allocation3], %s2163_s24  ;;  %s2169_s4 = scalar_lea.vmem (!%p2619_p10), [#allocation2], %s1434_s26 }
  0x51   : > { %1990 = dma.done.wait (%p2620_p4), %s179_s30, 128  }
  0x52   : > { %1992 = vsyncadd (%p2620_p4), %s179_s30, 4294967168  ;;  %p2621_p8 = scmp.eq.s32.totalorder %s2066_s16, 0 }
  0x54   : > { %1994 = dma.done.wait (%p2621_p8), [#allocation6], 2176   ;;  %p2622_p3 = pmov %p2621_p8 }
  0x55   : > { %v2022_v0 = vmov 0.0   ;;  %vm2023_vm0 = vmmov 0   ;;  %v229_v1 = vld [vmem:[#allocation5 + $0x78] sm:$0xff]  ;;  %v228_v2 = vld [vmem:[#allocation5 + $0x70] sm:$0xff]  ;;  %v227_v3 = vld [vmem:[#allocation5 + $0x68] sm:$0xff]  ;;  %vm872_vm1 = vcmask 64512  }
  0x56   : > { %1996 = vsyncadd (%p2622_p3), [#allocation6], 4294965120  ;;  %1556 = vmatprep.subr.mxu0 %v2022_v0  ;;  %1591 = vmatprep.subr.mxu1 %v2022_v0  ;;  %v2185_v4 = vand.u32 4294901760, %v229_v1  ;;  %v2187_v5 = vand.u32 4294901760, %v228_v2  ;;  %v2189_v6 = vand.u32 4294901760, %v227_v3  ;;  %v226_v7 = vld [vmem:[#allocation5 + $0x60] sm:$0xff] }
  0x57   : > { %1588 = vmatprep.mubr.msk.f32.mxu0 %vm2023_vm0, %v2022_v0  ;;  %1623 = vmatprep.mubr.msk.f32.mxu1 %vm2023_vm0, %v2022_v0  ;;  %v225_v8 = vld [vmem:[#allocation5 + $0x58] sm:$0xff]  ;;  %v224_v9 = vld [vmem:[#allocation5 + $0x50] sm:$0xff]  ;;  %v2191_v10 = vand.u32 4294901760, %v226_v7  ;;  %v223_v13 = vld [vmem:[#allocation5 + $0x48] sm:$0xff]  ;;  %s1439_s18 = sshll.u32 %s2066_s16, 7  ;;  %s212_s20 = scalar_lea.vmem [#allocation8], %s1434_s26 }
  0x58   : > { %v2193_v11 = vand.u32 4294901760, %v225_v8  ;;  %v2195_v12 = vand.u32 4294901760, %v224_v9  ;;  %v222_v14 = vld [vmem:[#allocation5 + $0x40] sm:$0xff]  ;;  %1557 = vmatpush3.msra.mxu0 %v2185_v4  ;;  %v2199_v15 = vsub.f32 %v229_v1, %v2185_v4  ;;  %v2202_v16 = vsub.f32 %v228_v2, %v2187_v5  ;;  %v221_v19 = vld [vmem:[#allocation5 + $0x38] sm:$0xff]  ;;  %v220_v26 = vld [vmem:[#allocation5 + $0x30] sm:$0xff]  ;;  %s1337_s25 = sshll.u32 %s212_s20, 4  ;;  %s2567_s29 = scalar_lea.hbm %s2607_s3, %s1439_s18  ;;  %s1338_s25 = int_to_ptr.vmem [resolvable:$true] %s1337_s25 }
  0x59   : > { %v2204_v17 = vand.u32 4294901760, %v223_v13  ;;  %v2207_v18 = vsub.f32 %v227_v3, %v2189_v6  ;;  %1558 = vmatprep.subr.mxu0 %v2022_v0  ;;  %v2211_v20 = vsub.f32 %v226_v7, %v2191_v10  ;;  %v2220_v25 = vand.u32 4294901760, %v222_v14  ;;  %v219_v36 = vld [vmem:[#allocation5 + $0x28] sm:$0xff]  ;;  %v218_v41 = vld [vmem:[#allocation5 + $0x20] sm:$0xff]  ;;  %v217_v49 = vld [vmem:[#allocation5 + $0x18] sm:$0xff]  ;;  %s1324_s5 = scalar_lea.sflag [#allocation4], %s2163_s24 }
  0x5a   : > { %v2214_v21 = vsub.f32 %v225_v8, %v2193_v11  ;;  %1559 = vmatpush3.msra.mxu0 %v2187_v5  ;;  %v324_v22 = vand.u32 4294901760, %v2199_v15  ;;  %v331_v23 = vand.u32 4294901760, %v2202_v16  ;;  %v2224_v28 = vand.u32 4294901760, %v221_v19  ;;  %v213_v50 = vld [vmem:[%s2169_s4] sm:$0xff]  ;;  %v215_v60 = vld [vmem:[#allocation5 + $0x8] sm:$0xff]  ;;  %v214_v7 = vld [vmem:[#allocation5] sm:$0xff] }
  0x5b   : > { %v338_v24 = vand.u32 4294901760, %v2207_v18  ;;  %1560 = vmatprep.subr.mxu0 %v2022_v0  ;;  %v345_v27 = vand.u32 4294901760, %v2211_v20  ;;  %v2228_v30 = vsub.f32 %v224_v9, %v2195_v12  ;;  %v2241_v34 = vsub.f32 %v223_v13, %v2204_v17  ;;  %v216_v54 = vld [vmem:[#allocation5 + $0x10] sm:$0xff]  ;;  %s1947_s6 = scalar_lea.vmem %s1338_s25, 128  ;;  %p2623_p0 = scmp.ne.s32.totalorder %s2617_s10, 0 }
  0x5c   : > { %v352_v29 = vand.u32 4294901760, %v2214_v21  ;;  %1561 = vmatpush3.msra.mxu0 %v2189_v6  ;;  %v325_v31 = vsub.f32 %v2199_v15, %v324_v22  ;;  %v332_v32 = vsub.f32 %v2202_v16, %v331_v23  ;;  %v2244_v35 = vand.u32 4294901760, %v220_v26  ;;  %p1948_p11 = scmp.ne.s32.totalorder %s1338_s25, %s1947_s6  ;;  %s2024_s16 = smov [#allocation8]  }
  0x5d   : > { %v339_v33 = vsub.f32 %v2207_v18, %v338_v24  ;;  %1562 = vmatprep.subr.mxu0 %v2022_v0  ;;  %v346_v39 = vsub.f32 %v2211_v20, %v345_v27  ;;  %v359_v40 = vand.u32 4294901760, %v2228_v30  ;;  %v2256_v43 = vsub.f32 %v222_v14, %v2220_v25  ;;  %s1951_s8 = sshll.u32 %s2024_s16, 4  ;;  %s1952_s8 = int_to_ptr.vmem [resolvable:$false] %s1951_s8 }
  0x5e   : > { %1563 = vmatpush3.msra.mxu0 %v2191_v10  ;;  %v326_v37 = vand.u32 4294901760, %v325_v31  ;;  %v333_v38 = vand.u32 4294901760, %v332_v32  ;;  %v353_v42 = vsub.f32 %v2214_v21, %v352_v29  ;;  %v2259_v45 = vand.u32 4294901760, %v219_v36  ;;  %p1949_p1 = pnand %p1948_p11, %p2623_p0  ;;  %s1953_s9 = scalar_lea.vmem %s1952_s8, 256 }
  0x5f   : > { %1564 = vmatprep.subr.mxu0 %v2022_v0  ;;  %v340_v44 = vand.u32 4294901760, %v339_v33  ;;  %v366_v46 = vand.u32 4294901760, %v2241_v34  ;;  %v2263_v47 = vsub.f32 %v221_v19, %v2224_v28  ;;  %v2267_v48 = vand.u32 4294901760, %v218_v41  ;;  %p1954_p6 = scmp.lt.s32.totalorder %s1338_s25, %s1952_s8  ;;  %p1955_p12 = scmp.lt.s32.totalorder %s1953_s9, %s1947_s6 }
  0x60   : > { %1565 = vmatpush3.msra.mxu0 %v2193_v11  ;;  %1592 = vmatpush3.msra.mxu1 %v326_v37  ;;  %v347_v51 = vand.u32 4294901760, %v346_v39  ;;  %v360_v52 = vsub.f32 %v2228_v30, %v359_v40  ;;  %v373_v53 = vand.u32 4294901760, %v2256_v43  ;;  %v2276_v55 = vsub.f32 %v220_v26, %v2244_v35  ;;  %p1950_p2 = pneg %p1949_p1 }
  0x61   : > { %1566 = vmatprep.subr.mxu0 %v2022_v0  ;;  %1593 = vmatprep.subr.mxu1 %v2022_v0  ;;  %v354_v56 = vand.u32 4294901760, %v353_v42  ;;  %v380_v57 = vand.u32 4294901760, %v2263_v47  ;;  %v367_v58 = vsub.f32 %v2241_v34, %v366_v46  ;;  %v2285_v59 = vand.u32 4294901760, %v217_v49  ;;  %p1956_p7 = por %p1955_p12, %p1954_p6 }
  0x62   : > { %1567 = vmatpush3.msra.mxu0 %v2195_v12  ;;  %1594 = vmatpush3.msra.mxu1 %v333_v38  ;;  %v2288_v61 = vsub.f32 %v219_v36, %v2259_v45  ;;  %v2290_v62 = vand.u32 4294901760, %v213_v50  ;;  %v2294_v63 = vand.u32 4294901760, %v216_v54  ;;  %v361_v1 = vand.u32 4294901760, %v360_v52 }
  0x63   : > { %1568 = vmatprep.subr.mxu0 %v2022_v0  ;;  %1595 = vmatprep.subr.mxu1 %v2022_v0  ;;  %v374_v2 = vsub.f32 %v2256_v43, %v373_v53  ;;  %v387_v3 = vand.u32 4294901760, %v2276_v55  ;;  %v2302_v8 = vsub.f32 %v218_v41, %v2267_v48  ;;  %v381_v9 = vsub.f32 %v2263_v47, %v380_v57  ;;  %p1957_p9 = pnand %p1956_p7, %p1950_p2 }
  0x64   : > { %1569 = vmatpush3.msra.mxu0 %v2204_v17  ;;  %1596 = vmatpush3.msra.mxu1 %v340_v44  ;;  %v2309_v13 = vand.u32 4294901760, %v215_v60  ;;  %v368_v14 = vand.u32 4294901760, %v367_v58  ;;  %v394_v19 = vand.u32 4294901760, %v2288_v61  ;;  %v2314_v26 = vsub.f32 %v213_v50, %v2290_v62 }
  0x65   : > { %1570 = vmatprep.subr.mxu0 %v2022_v0  ;;  %1597 = vmatprep.subr.mxu1 %v2022_v0  ;;  %v2317_v31 = vsub.f32 %v217_v49, %v2285_v59  ;;  %v2321_v32 = vand.u32 4294901760, %v214_v7  ;;  %v375_v33 = vand.u32 4294901760, %v374_v2  ;;  %v388_v36 = vsub.f32 %v2276_v55, %v387_v3 }
  0x66   : > { %1571 = vmatpush3.msra.mxu0 %v2220_v25  ;;  %1598 = vmatpush3.msra.mxu1 %v347_v51  ;;  %v401_v37 = vand.u32 4294901760, %v2302_v8  ;;  %v2329_v38 = vsub.f32 %v216_v54, %v2294_v63  ;;  %v382_v39 = vand.u32 4294901760, %v381_v9  ;;  %v395_v41 = vsub.f32 %v2288_v61, %v394_v19 }
  0x67   : > { %1572 = vmatprep.subr.mxu0 %v2022_v0  ;;  %1599 = vmatprep.subr.mxu1 %v2022_v0  ;;  %v313_v42 = vand.u32 4294901760, %v2314_v26  ;;  %v408_v44 = vand.u32 4294901760, %v2317_v31  ;;  %v2340_v49 = vsub.f32 %v215_v60, %v2309_v13  ;;  %v389_v50 = vand.u32 4294901760, %v388_v36 }
  0x68   : > { %1573 = vmatpush3.msra.mxu0 %v2224_v28  ;;  %1600 = vmatpush3.msra.mxu1 %v354_v56  ;;  %v402_v51 = vsub.f32 %v2302_v8, %v401_v37  ;;  %v415_v52 = vand.u32 4294901760, %v2329_v38  ;;  %v2350_v54 = vsub.f32 %v214_v7, %v2321_v32  ;;  %v396_v56 = vand.u32 4294901760, %v395_v41 }
  0x69   : > { %1574 = vmatprep.subr.mxu0 %v2022_v0  ;;  %1601 = vmatprep.subr.mxu1 %v2022_v0  ;;  %v314_v58 = vsub.f32 %v2314_v26, %v313_v42  ;;  %v409_v60 = vsub.f32 %v2317_v31, %v408_v44 }
  0x6a   : > { %1575 = vmatpush3.msra.mxu0 %v2244_v35  ;;  %1602 = vmatpush3.msra.mxu1 %v361_v1  ;;  %v422_v1 = vand.u32 4294901760, %v2340_v49  ;;  %v403_v2 = vand.u32 4294901760, %v402_v51  ;;  %v416_v7 = vsub.f32 %v2329_v38, %v415_v52  ;;  %v429_v9 = vand.u32 4294901760, %v2350_v54 }
  0x6b   : > { %1576 = vmatprep.subr.mxu0 %v2022_v0  ;;  %1603 = vmatprep.subr.mxu1 %v2022_v0 }
  0x6c   : > { %1577 = vmatpush3.msra.mxu0 %v2259_v45  ;;  %1604 = vmatpush3.msra.mxu1 %v368_v14  ;;  %v315_v14 = vand.u32 4294901760, %v314_v58  ;;  %v423_v36 = vsub.f32 %v2340_v49, %v422_v1  ;;  %v430_v41 = vsub.f32 %v2350_v54, %v429_v9 }
  0x6d   : > { %1578 = vmatprep.subr.mxu0 %v2022_v0  ;;  %1605 = vmatprep.subr.mxu1 %v2022_v0 }
  0x6e   : > { %1579 = vmatpush3.msra.mxu0 %v2267_v48  ;;  %1606 = vmatpush3.msra.mxu1 %v375_v33  ;;  %v410_v33 = vand.u32 4294901760, %v409_v60  ;;  %v431_v51 = vand.u32 4294901760, %v430_v41 }
  0x6f   : > { %1580 = vmatprep.subr.mxu0 %v2022_v0  ;;  %1607 = vmatprep.subr.mxu1 %v2022_v0 }
  0x70   : > { %1581 = vmatpush3.msra.mxu0 %v2285_v59  ;;  %1608 = vmatpush3.msra.mxu1 %v382_v39  ;;  %v417_v39 = vand.u32 4294901760, %v416_v7 }
  0x71   : > { %1582 = vmatprep.subr.mxu0 %v2022_v0  ;;  %1609 = vmatprep.subr.mxu1 %v2022_v0 }
  0x72   : > { %1583 = vmatpush3.msra.mxu0 %v2294_v63  ;;  %1610 = vmatpush3.msra.mxu1 %v389_v50  ;;  %v424_v50 = vand.u32 4294901760, %v423_v36 }
  0x73   : > { %1584 = vmatprep.subr.mxu0 %v2022_v0  ;;  %1611 = vmatprep.subr.mxu1 %v2022_v0 }
  0x74   : > { %1585 = vmatpush3.msra.mxu0 %v2309_v13  ;;  %1612 = vmatpush3.msra.mxu1 %v396_v56 }
  0x75   : > { %1586 = vmatprep.subr.mxu0 %v2022_v0  ;;  %1613 = vmatprep.subr.mxu1 %v2022_v0 }
  0x76   : > { %1587 = vmatpush3.msra.mxu0 %v2321_v32  ;;  %1614 = vmatpush3.msra.mxu1 %v403_v2 }
  0x77   : > { %1615 = vmatprep.subr.mxu1 %v2022_v0  ;;  %1626 = vmatprep.subr.mxu0 %v2022_v0 }
  0x78   : > { %1589 = vmatmul.mubr.f32.vlgmr.msra.gmra.mxu0 %v315_v14  ;;  %1616 = vmatpush3.msra.mxu1 %v410_v33 }
  0x79   : > { %1627 = vmatpush3.msra.mxu0 %v2199_v15  ;;  %1617 = vmatprep.subr.mxu1 %v2022_v0 }
  0x7a   : > { %1628 = vmatprep.subr.mxu0 %v2022_v0  ;;  %1618 = vmatpush3.msra.mxu1 %v417_v39 }
  0x7b   : > { %1629 = vmatpush3.msra.mxu0 %v2202_v16  ;;  %1619 = vmatprep.subr.mxu1 %v2022_v0 }
  0x7c   : > { %1630 = vmatprep.subr.mxu0 %v2022_v0  ;;  %1620 = vmatpush3.msra.mxu1 %v424_v50 }
  0x7d   : > { %1631 = vmatpush3.msra.mxu0 %v2207_v18  ;;  %1621 = vmatprep.subr.mxu1 %v2022_v0 }
  0x7e   : > { %1632 = vmatprep.subr.mxu0 %v2022_v0  ;;  %1622 = vmatpush3.msra.mxu1 %v431_v51 }
  0x7f   : > { %1633 = vmatpush3.msra.mxu0 %v2211_v20  ;;  %1624 = vmatmul.mubr.f32.vlgmr.msra.gmra.mxu1 %v2290_v62 }
  0x80   : > { %1634 = vmatprep.subr.mxu0 %v2022_v0  ;;  %1661 = vmatprep.subr.mxu1 %v2022_v0 }
  0x81   : > { %1635 = vmatpush3.msra.mxu0 %v2214_v21  ;;  %1662 = vmatpush3.msra.mxu1 %v2185_v4 }
  0x82   : > { %1636 = vmatprep.subr.mxu0 %v2022_v0  ;;  %1663 = vmatprep.subr.mxu1 %v2022_v0 }
  0x83   : > { %1637 = vmatpush3.msra.mxu0 %v2228_v30  ;;  %1664 = vmatpush3.msra.mxu1 %v2187_v5 }
  0x84   : > { %1638 = vmatprep.subr.mxu0 %v2022_v0  ;;  %1665 = vmatprep.subr.mxu1 %v2022_v0 }
  0x85   : > { %1639 = vmatpush3.msra.mxu0 %v2241_v34  ;;  %1666 = vmatpush3.msra.mxu1 %v2189_v6 }
  0x86   : > { %1640 = vmatprep.subr.mxu0 %v2022_v0  ;;  %1667 = vmatprep.subr.mxu1 %v2022_v0 }
  0x87   : > { %1641 = vmatpush3.msra.mxu0 %v2256_v43  ;;  %1668 = vmatpush3.msra.mxu1 %v2191_v10 }
  0x88   : > { %1642 = vmatprep.subr.mxu0 %v2022_v0  ;;  %1669 = vmatprep.subr.mxu1 %v2022_v0 }
  0x89   : > { %1643 = vmatpush3.msra.mxu0 %v2263_v47  ;;  %1670 = vmatpush3.msra.mxu1 %v2193_v11 }
  0x8a   : > { %1644 = vmatprep.subr.mxu0 %v2022_v0  ;;  %1671 = vmatprep.subr.mxu1 %v2022_v0 }
  0x8b   : > { %1645 = vmatpush3.msra.mxu0 %v2276_v55  ;;  %1672 = vmatpush3.msra.mxu1 %v2195_v12 }
  0x8c   : > { %1646 = vmatprep.subr.mxu0 %v2022_v0  ;;  %1673 = vmatprep.subr.mxu1 %v2022_v0 }
  0x8d   : > { %1647 = vmatpush3.msra.mxu0 %v2288_v61  ;;  %1674 = vmatpush3.msra.mxu1 %v2204_v17 }
  0x8e   : > { %1648 = vmatprep.subr.mxu0 %v2022_v0  ;;  %1675 = vmatprep.subr.mxu1 %v2022_v0 }
  0x8f   : > { %1649 = vmatpush3.msra.mxu0 %v2302_v8  ;;  %1676 = vmatpush3.msra.mxu1 %v2220_v25 }
  0x90   : > { %1650 = vmatprep.subr.mxu0 %v2022_v0  ;;  %1677 = vmatprep.subr.mxu1 %v2022_v0 }
  0x91   : > { %1651 = vmatpush3.msra.mxu0 %v2317_v31  ;;  %1678 = vmatpush3.msra.mxu1 %v2224_v28 }
  0x92   : > { %1652 = vmatprep.subr.mxu0 %v2022_v0  ;;  %1679 = vmatprep.subr.mxu1 %v2022_v0 }
  0x93   : > { %1653 = vmatpush3.msra.mxu0 %v2329_v38  ;;  %1680 = vmatpush3.msra.mxu1 %v2244_v35 }
  0x94   : > { %1654 = vmatprep.subr.mxu0 %v2022_v0  ;;  %1681 = vmatprep.subr.mxu1 %v2022_v0 }
  0x95   : > { %1655 = vmatpush3.msra.mxu0 %v2340_v49  ;;  %1682 = vmatpush3.msra.mxu1 %v2259_v45 }
  0x96   : > { %1656 = vmatprep.subr.mxu0 %v2022_v0  ;;  %1683 = vmatprep.subr.mxu1 %v2022_v0 }
  0x97   : > { %1657 = vmatpush3.msra.mxu0 %v2350_v54  ;;  %1658 = vmatprep.mubr.msk.f32.mxu0 %vm2023_vm0, %v2022_v0 }
  0x98   : > { %1684 = vmatpush3.msra.mxu1 %v2267_v48  ;;  %1659 = vmatmul.mubr.f32.vlgmr.msra.gmra.mxu0 %v2314_v26 }
  0x99   : > { %1685 = vmatprep.subr.mxu1 %v2022_v0  ;;  %1696 = vmatprep.subr.mxu0 %v2022_v0 }
  0x9a   : > { %1686 = vmatpush3.msra.mxu1 %v2285_v59  ;;  %1697 = vmatpush3.msra.mxu0 %v324_v22 }
  0x9b   : > { %1687 = vmatprep.subr.mxu1 %v2022_v0  ;;  %1698 = vmatprep.subr.mxu0 %v2022_v0 }
  0x9c   : > { %1688 = vmatpush3.msra.mxu1 %v2294_v63  ;;  %1699 = vmatpush3.msra.mxu0 %v331_v23 }
  0x9d   : > { %1689 = vmatprep.subr.mxu1 %v2022_v0  ;;  %1700 = vmatprep.subr.mxu0 %v2022_v0 }
  0x9e   : > { %1690 = vmatpush3.msra.mxu1 %v2309_v13  ;;  %1701 = vmatpush3.msra.mxu0 %v338_v24 }
  0x9f   : > { %1691 = vmatprep.subr.mxu1 %v2022_v0  ;;  %1702 = vmatprep.subr.mxu0 %v2022_v0 }
  0xa0   : > { %1692 = vmatpush3.msra.mxu1 %v2321_v32  ;;  %1693 = vmatprep.mubr.msk.f32.mxu1 %vm2023_vm0, %v2022_v0 }
  0xa1   : > { %1703 = vmatpush3.msra.mxu0 %v345_v27  ;;  %1694 = vmatmul.mubr.f32.vlgmr.msra.gmra.mxu1 %v313_v42 }
  0xa2   : > { %1704 = vmatprep.subr.mxu0 %v2022_v0  ;;  %1731 = vmatprep.subr.mxu1 %v2022_v0 }
  0xa3   : > { %1705 = vmatpush3.msra.mxu0 %v352_v29  ;;  %1732 = vmatpush3.msra.mxu1 %v2185_v4 }
  0xa4   : > { %1706 = vmatprep.subr.mxu0 %v2022_v0  ;;  %1733 = vmatprep.subr.mxu1 %v2022_v0 }
  0xa5   : > { %1707 = vmatpush3.msra.mxu0 %v359_v40  ;;  %1734 = vmatpush3.msra.mxu1 %v2187_v5 }
  0xa6   : > { %1708 = vmatprep.subr.mxu0 %v2022_v0  ;;  %1735 = vmatprep.subr.mxu1 %v2022_v0 }
  0xa7   : > { %1709 = vmatpush3.msra.mxu0 %v366_v46  ;;  %1736 = vmatpush3.msra.mxu1 %v2189_v6 }
  0xa8   : > { %1710 = vmatprep.subr.mxu0 %v2022_v0  ;;  %1737 = vmatprep.subr.mxu1 %v2022_v0 }
  0xa9   : > { %1711 = vmatpush3.msra.mxu0 %v373_v53  ;;  %1738 = vmatpush3.msra.mxu1 %v2191_v10 }
  0xaa   : > { %1712 = vmatprep.subr.mxu0 %v2022_v0  ;;  %1739 = vmatprep.subr.mxu1 %v2022_v0 }
  0xab   : > { %1713 = vmatpush3.msra.mxu0 %v380_v57  ;;  %1740 = vmatpush3.msra.mxu1 %v2193_v11 }
  0xac   : > { %1714 = vmatprep.subr.mxu0 %v2022_v0  ;;  %1741 = vmatprep.subr.mxu1 %v2022_v0 }
  0xad   : > { %1715 = vmatpush3.msra.mxu0 %v387_v3  ;;  %1742 = vmatpush3.msra.mxu1 %v2195_v12 }
  0xae   : > { %1716 = vmatprep.subr.mxu0 %v2022_v0  ;;  %1743 = vmatprep.subr.mxu1 %v2022_v0 }
  0xaf   : > { %1717 = vmatpush3.msra.mxu0 %v394_v19  ;;  %1744 = vmatpush3.msra.mxu1 %v2204_v17  ;;  %v871_v17 = vld [vmem:[#allocation7] sm:$0xff] }
  0xb0   : > { %1718 = vmatprep.subr.mxu0 %v2022_v0  ;;  %1745 = vmatprep.subr.mxu1 %v2022_v0  ;;  %v874_v18 = vsel %vm872_vm1, %v871_v17, 0 }
  0xb1   : > { %1719 = vmatpush3.msra.mxu0 %v401_v37  ;;  %1746 = vmatpush3.msra.mxu1 %v2220_v25  ;;  %v942_v20 = vand.u32 4294901760, %v874_v18 }
  0xb2   : > { %1720 = vmatprep.subr.mxu0 %v2022_v0  ;;  %1747 = vmatprep.subr.mxu1 %v2022_v0 }
  0xb3   : > { %1721 = vmatpush3.msra.mxu0 %v408_v44  ;;  %1748 = vmatpush3.msra.mxu1 %v2224_v28  ;;  %v943_v21 = vsub.f32 %v874_v18, %v942_v20 }
  0xb4   : > { %1722 = vmatprep.subr.mxu0 %v2022_v0  ;;  %1749 = vmatprep.subr.mxu1 %v2022_v0 }
  0xb5   : > { %1723 = vmatpush3.msra.mxu0 %v415_v52  ;;  %1750 = vmatpush3.msra.mxu1 %v2244_v35  ;;  %v944_v25 = vand.u32 4294901760, %v943_v21 }
  0xb6   : > { %1724 = vmatprep.subr.mxu0 %v2022_v0  ;;  %1751 = vmatprep.subr.mxu1 %v2022_v0 }
  0xb7   : > { %1725 = vmatpush3.msra.mxu0 %v422_v1  ;;  %1752 = vmatpush3.msra.mxu1 %v2259_v45  ;;  %v945_v29 = vsub.f32 %v943_v21, %v944_v25 }
  0xb8   : > { %1726 = vmatprep.subr.mxu0 %v2022_v0  ;;  %1753 = vmatprep.subr.mxu1 %v2022_v0 }
  0xb9   : > { %1727 = vmatpush3.msra.mxu0 %v429_v9  ;;  %1728 = vmatprep.mubr.msk.f32.mxu0 %vm2023_vm0, %v2022_v0  ;;  %v946_v43 = vand.u32 4294901760, %v945_v29 }
  0xba   : > { %1754 = vmatpush3.msra.mxu1 %v2267_v48  ;;  %1729 = vmatmul.mubr.f32.vlgmr.msra.gmra.mxu0 %v2290_v62 }
  0xbb   : > { %1755 = vmatprep.subr.mxu1 %v2022_v0  ;;  %1763 = vmatprep.mubr.msk.f32.mxu1 %vm2023_vm0, %v2022_v0 }
  0xbc   : > { %1756 = vmatpush3.msra.mxu1 %v2285_v59  ;;  %1766 = vmatprep.subr.mxu0 %v2022_v0 }
  0xbd   : > { %1757 = vmatprep.subr.mxu1 %v2022_v0  ;;  %1768 = vmatprep.mubr.msk.f32.mxu0 %vm2023_vm0, %v2022_v0 }
  0xbe   : > { %1758 = vmatpush3.msra.mxu1 %v2294_v63 }
  0xbf   : > { %1759 = vmatprep.subr.mxu1 %v2022_v0 }
  0xc0   : > { %1760 = vmatpush3.msra.mxu1 %v2309_v13 }
  0xc1   : > { %1761 = vmatprep.subr.mxu1 %v2022_v0 }
  0xc2   : > { %1762 = vmatpush3.msra.mxu1 %v2321_v32 }
  0xc3   : > { %1764 = vmatmul.mubr.f32.vlgmr.msra.gmra.mxu1 %v2290_v62  ;;  %1771 = vmatprep.subr.mxu1 %v2022_v0 }
  0xc4   : > { %1773 = vmatprep.mubr.msk.f32.mxu1 %vm2023_vm0, %v2022_v0 }
 0x138   : > { %v317_v4 = vpop.f32.mrf.mxu0 }
 0x13a   : > { %v1590_v5 = vpop.f32.mrf.mxu0 }
 0x13f   : > { %v468_v6 = vpop.f32.mrf.mxu1 }
 0x140   : > { %v469_v23 = vadd.f32 %v468_v6, %v317_v4 }
 0x141   : > { %v1625_v10 = vpop.f32.mrf.mxu1 }
 0x158   : > { %v572_v11 = vpop.f32.mrf.mxu0 }
 0x159   : > { %v573_v27 = vadd.f32 %v572_v11, %v469_v23 }
 0x15a   : > { %v1660_v12 = vpop.f32.mrf.mxu0 }
 0x161   : > { %v661_v15 = vpop.f32.mrf.mxu1 }
 0x162   : > { %v662_v28 = vadd.f32 %v661_v15, %v573_v27 }
 0x163   : > { %v1695_v16 = vpop.f32.mrf.mxu1 }
 0x17a   : > { %v780_v22 = vpop.f32.mrf.mxu0 }
 0x17b   : > { %v781_v30 = vadd.f32 %v780_v22, %v662_v28 }
 0x17c   : > { %v1730_v24 = vpop.f32.mrf.mxu0 }
 0x183   : > { %v867_v34 = vpop.f32.mrf.mxu1 }
 0x184   : > { %v868_v35 = vadd.f32 %v867_v34, %v781_v30 }
 0x185   : > { %v1765_v40 = vpop.f32.mrf.mxu1 }
 0x186   : > { %v907_v45 = vand.u32 4294901760, %v868_v35 }
 0x188   : > { %v984_v46 = vsub.f32 %v868_v35, %v907_v45  ;;  %1767 = vmatpush3.msra.mxu0 %v907_v45 }
 0x189   : > { %1769 = vmatmul.mubr.f32.vlgmr.msra.gmra.mxu0 %v946_v43  ;;  %1776 = vmatprep.subr.mxu0 %v2022_v0 }
 0x18a   : > { %v985_v47 = vand.u32 4294901760, %v984_v46  ;;  %1777 = vmatpush3.msra.mxu0 %v984_v46  ;;  %1778 = vmatprep.mubr.msk.f32.mxu0 %vm2023_vm0, %v2022_v0 }
 0x18b   : > { %1786 = vmatprep.subr.mxu0 %v2022_v0 }
 0x18c   : > { %v986_v48 = vsub.f32 %v984_v46, %v985_v47 }
 0x18d   : > { %1779 = vmatmul.mubr.f32.vlgmr.msra.gmra.mxu0 %v943_v21 }
 0x18e   : > { %1787 = vmatpush3.msra.mxu0 %v985_v47  ;;  %v987_v53 = vand.u32 4294901760, %v986_v48  ;;  %1788 = vmatprep.mubr.msk.f32.mxu0 %vm2023_vm0, %v2022_v0 }
 0x190   : > { %1772 = vmatpush3.msra.mxu1 %v987_v53 }
 0x191   : > { %1774 = vmatmul.mubr.f32.vlgmr.msra.gmra.mxu1 %v942_v20  ;;  %1781 = vmatprep.subr.mxu1 %v2022_v0 }
 0x192   : > { %1782 = vmatpush3.msra.mxu1 %v907_v45  ;;  %1783 = vmatprep.mubr.msk.f32.mxu1 %vm2023_vm0, %v2022_v0 }
 0x193   : > { %1791 = vmatprep.subr.mxu1 %v2022_v0  ;;  %1789 = vmatmul.mubr.f32.vlgmr.msra.gmra.mxu0 %v942_v20 }
 0x195   : > { %1784 = vmatmul.mubr.f32.vlgmr.msra.gmra.mxu1 %v944_v25 }
 0x196   : > { %1792 = vmatpush3.msra.mxu1 %v907_v45  ;;  %1793 = vmatprep.mubr.msk.f32.mxu1 %vm2023_vm0, %v2022_v0 }
 0x199   : > { %1794 = vmatmul.mubr.f32.vlgmr.msra.gmra.mxu1 %v942_v20 }
 0x249   : > { %v948_v55 = vpop.f32.mrf.mxu0 }
 0x24b   : > { %v1770_v57 = vpop.f32.mrf.mxu0 }
 0x24d   : > { %v1098_v59 = vpop.f32.mrf.mxu0 }
 0x24f   : > { %v1780_v61 = vpop.f32.mrf.mxu0 }
 0x251   : > { %v1024_v62 = vpop.f32.mrf.mxu1 }
 0x252   : > { %v1025_v63 = vadd.f32 %v1024_v62, %v948_v55 }
 0x253   : > { %v1775_v3 = vpop.f32.mrf.mxu1  ;;  %v1246_v8 = vpop.f32.mrf.mxu0 }
 0x254   : > { %v1099_v13 = vadd.f32 %v1098_v59, %v1025_v63 }
 0x255   : > { %v1172_v19 = vpop.f32.mrf.mxu1  ;;  %v1790_v26 = vpop.f32.mrf.mxu0 }
 0x256   : > { %v1173_v31 = vadd.f32 %v1172_v19, %v1099_v13 }
 0x257   : > { %v1785_v32 = vpop.f32.mrf.mxu1 }
 0x258   : > { %v1247_v0 = vadd.f32 %v1246_v8, %v1173_v31 }
 0x259   : > { %v1318_v37 = vpop.f32.mrf.mxu1 }
 0x25a   : > { %v1319_v38 = vadd.f32 %v1318_v37, %v1247_v0 }
 0x25b   : > { %v1795_v42 = vpop.f32.mrf.mxu1 }
 0x25c   : > { %1322 = vst [vmem:[%s212_s20] sm:$0xff] %v1319_v38 }
 0x25d   : > { %1960 = shalt.err (!%p1957_p9)
}
 0x25e   : > { %s1961_s21 = scalar_lea.hbm %s2567_s29, 128  ;;  %s1965_s23 = scalar_lea.hbm %s2607_s3, 256 }
 0x25f   : > { %p1962_p13 = scmp.ne.s32.totalorder %s2567_s29, %s1961_s21  ;;  %p1966_p4 = scmp.lt.s32.totalorder %s2567_s29, %s2607_s3 }
 0x260   : > { %p1967_p8 = scmp.lt.s32.totalorder %s1965_s23, %s1961_s21 }
 0x261   : > { %p1963_p5 = pnand %p1962_p13, %p2623_p0 }
 0x262   : > { %p1968_p3 = por %p1967_p8, %p1966_p4 }
 0x263   : > { %p1964_p10 = pneg %p1963_p5 }
 0x265   : > { %p1969_p11 = pnand %p1968_p3, %p1964_p10 }
 0x267   : > { %1972 = shalt.err (!%p1969_p11)
}
 0x268   : > { %1806 = dma.vmem_to_hbm [thread:$0]  (%p2623_p0), %s1338_s25, 128, %s2567_s29, %s1324_s5  }
 0x269 PF: > { %s1349_s30 = sand.u32 1, %s2003_s12   ;;  %p2624_p1 = scmp.ne.s32.totalorder %s2613_s19, 0 }
 0x26a   : > { %p2625_p2 = scmp.ge.s32.totalorder %s2015_s15, 2  ;;  %s1350_s4 = scalar_lea.sflag [#allocation4], %s1349_s30 }
 0x26c   : > { %p1820_p6 = pnand %p2625_p2, %p2624_p1 }
 0x26e   : > { %p1821_p12 = pneg %p1820_p6 }
 0x270   : > { %1998 = dma.done.wait (%p1821_p12), %s1350_s4, 128  }
 0x271   : > { %2000 = vsyncadd (%p1821_p12), %s1350_s4, 4294967168  ;;  %p17_p7 = scmp.ge.s32.totalorder %s2117_s7, 4   ;;  %s2626_s12 = smov %s2007_s13 }
 0x272   : > { %s2627_s13 = smov %s2011_s14  ;;  %s2628_s14 = smov %s2133_s11 }
 0x273   : > { %s2629_s15 = smov %s2117_s7  ;;  %19 = sbr.rel (!%p17_p7) target bundleno = 6 (0x6), region = 85 }
 0x278   :  { %1355 = vsyncpa [#allocation3], 1 }
 0x279   :  { %1357 = vsyncpa [#allocation3 + $0x1], 1 }
 0x27a   :  { %1358 = vsyncpa [#allocation6], 1 }
 0x27b   :  { %1359 = vsyncpa [#allocation4], 1 }
 0x27c   :  { %1361 = vsyncpa [#allocation4 + $0x1], 1 }

</bundles_post_ra>
